<compile_context>
chip_gen: v5e
topology: v5e:2x2
jax: 0.10.0
libtpu: 0.0.40
codegen_flags: <defaults>
</compile_context>

<pallas_src>
import numpy as np
import jax
import jax.numpy as jnp
from jax.experimental import pallas as pl
from jax.experimental.pallas import tpu as pltpu


def position_encoding_init(n_position, emb_dim):
    """Sinusoid table — identical recipe to the PyTorch module's static init."""
    pos = np.arange(n_position, dtype=np.float64)[:, None]
    j = np.arange(emb_dim, dtype=np.float64)[None, :]
    angle = pos / np.power(10000.0, 2.0 * np.floor(j / 2.0) / emb_dim)
    angle[0, :] = 0.0                       # pos == 0 row stays all zero
    table = angle.copy()
    table[1:, 0::2] = np.sin(angle[1:, 0::2])
    table[1:, 1::2] = np.cos(angle[1:, 1::2])
    return jnp.asarray(table, dtype=jnp.float32)


def _pe_add_kernel(x_ref, pe_ref, o_ref):
    # x_ref: (r_tile, c_tile), pe_ref: (1, c_tile) -> broadcast-add over rows.
    # Native-dtype add (no f32 round-trip): bf16 stays on the bf16 VALU path
    # on v6e/v7x; f32 unchanged.
    o_ref[...] = x_ref[...] + pe_ref[...]


def _choose_tiles(rows, cols, itemsize, budget, total_bytes):
    """Pick (r_tile, c_tile) for the flattened (rows, cols) = (B, S*D) view.

    Legality: r_tile multiple of 8 or == rows; c_tile multiple of 128 or == cols.
    Live VMEM per step ~= double-buffered x + out tiles + double-buffered pe row.
    """
    def live(rt, ct):
        return (4 * rt + 2) * ct * itemsize

    r_tile, c_tile = rows, cols

    # 1) Shrink the batch (sublane) axis first — keeps the lane axis full width.
    if live(r_tile, c_tile) > budget and rows > 8:
        fit = budget // (4 * c_tile * itemsize)
        r_tile = min(rows, max(8, (fit // 8) * 8))

    # 2) Still too big: shrink the lane axis in 128-lane multiples (if tileable).
    if live(r_tile, c_tile) > budget and cols % 128 == 0 and cols > 128:
        fit = budget // ((4 * r_tile + 2) * itemsize)
        c_tile = min(cols, max(128, (fit // 128) * 128))
    # TODO(synk): if cols is not a multiple of 128 and still over budget we keep
    # the full-extent lane axis (unrealistic for this module's shapes).

    # 3) v7x megacore: ensure >= 2 parallel grid steps for non-trivial inputs.
    if r_tile == rows and c_tile == cols and total_bytes >= (1 << 20):
        if rows >= 16:
            r_tile = max(8, ((rows // 2 + 7) // 8) * 8)
        elif cols % 128 == 0 and cols >= 256:
            c_tile = max(128, ((cols // 2 + 127) // 128) * 128)

    return r_tile, c_tile


def positional_encoding(word_seq, pos_table, *, vmem_budget_bytes=None,
                        use_pallas=None, donate_input=False):
    """word_seq: (B, S, D); pos_table: (n_pos, D), n_pos >= S. Returns word_seq + table[:S]."""
    B, S, D = word_seq.shape
    n_pos, d_tab = pos_table.shape
    assert d_tab == D and n_pos >= S, (pos_table.shape, (S, D))

    # Slice to the actual sequence length and cast once to the activation dtype
    # (tiny one-time op; enables the native bf16 add path inside the kernel).
    pe = pos_table[:S]
    if pe.dtype != word_seq.dtype:
        pe = pe.astype(word_seq.dtype)

    itemsize = word_seq.dtype.itemsize
    total_bytes = word_seq.size * itemsize

    # Sub-VMEM-sized inputs: launch + per-step pipeline overhead dwarfs the data
    # movement; plain XLA fused add is strictly faster there.
    if use_pallas is None:
        use_pallas = total_bytes >= (1 << 20)
    if not use_pallas:
        return word_seq + pe[None, :, :]

    # Lane-dense 2-D view: last axis S*D (multiple of 128 for any pow-2 D >= 8),
    # batch on the sublane axis. pe becomes a single broadcastable row.
    rows, cols = B, S * D
    x2d = word_seq.reshape(rows, cols)
    pe2d = pe.reshape(1, cols)

    if vmem_budget_bytes is None:
        vmem_budget_bytes = 20 * 1024 * 1024   # live double-buffered set target
    r_tile, c_tile = _choose_tiles(rows, cols, itemsize, vmem_budget_bytes, total_bytes)

    grid = (pl.cdiv(rows, r_tile), pl.cdiv(cols, c_tile))
    live_bytes = (4 * r_tile + 2) * c_tile * itemsize
    # 32 MiB raises v5e's 16 MiB scoped default (legal: 128 MiB physical) and is
    # a no-op on v6e/v7x; grow only if the caller asked for a bigger budget.
    vmem_limit = int(max(32 * 1024 * 1024, live_bytes + 4 * 1024 * 1024))

    out2d = pl.pallas_call(
        _pe_add_kernel,
        out_shape=jax.ShapeDtypeStruct((rows, cols), word_seq.dtype),
        grid=grid,
        in_specs=[
            pl.BlockSpec((r_tile, c_tile), lambda r, c: (r, c)),
            pl.BlockSpec((1, c_tile), lambda r, c: (0, c)),
        ],
        out_specs=pl.BlockSpec((r_tile, c_tile), lambda r, c: (r, c)),
        compiler_params=pltpu.CompilerParams(
            dimension_semantics=("parallel", "parallel"),   # megacore-shardable
            vmem_limit_bytes=vmem_limit,
        ),
        input_output_aliases={0: 0} if donate_input else {},
    )(x2d, pe2d)

    return out2d.reshape(B, S, D)


if __name__ == "__main__":
    # config.hidden_size = 32, config.max_position_embeddings = 16, batch = 2
    B, MAX_LEN, EMB = 2, 16, 32

    key = jax.random.PRNGKey(0)
    word_seq = jax.random.normal(key, (B, MAX_LEN, EMB), jnp.float32)
    pe = position_encoding_init(MAX_LEN, EMB)

    # Force the Pallas path even at this tiny size so the kernel is exercised.
    out = jax.block_until_ready(positional_encoding(word_seq, pe, use_pallas=True))
    ref = word_seq + pe[None, :MAX_LEN, :]
    assert out.shape == (B, MAX_LEN, EMB), out.shape
    assert bool(jnp.allclose(out, ref, atol=1e-6, rtol=1e-6)), (
        f"max abs err = {float(jnp.max(jnp.abs(out - ref)))}")

    # Sequence shorter than the table (S < max_position_embeddings).
    S2 = 12
    word_seq2 = jax.random.normal(jax.random.PRNGKey(1), (B, S2, EMB), jnp.float32)
    out2 = jax.block_until_ready(positional_encoding(word_seq2, pe, use_pallas=True))
    ref2 = word_seq2 + pe[None, :S2, :]
    assert bool(jnp.allclose(out2, ref2, atol=1e-6, rtol=1e-6))

    # Tiny budget -> multi-step grid with partial tiles on both axes (masking path).
    B3 = 10
    word_seq3 = jax.random.normal(jax.random.PRNGKey(2), (B3, MAX_LEN, EMB), jnp.float32)
    out3 = jax.block_until_ready(
        positional_encoding(word_seq3, pe, use_pallas=True, vmem_budget_bytes=64 * 1024))
    ref3 = word_seq3 + pe[None, :MAX_LEN, :]
    assert bool(jnp.allclose(out3, ref3, atol=1e-6, rtol=1e-6))

    print("KERNEL_OK")
</pallas_src>

<mosaic_0001>
module attributes {stable_mosaic.version = 11 : i64} {
  func.func @_pe_add_kernel(%arg0: i32, %arg1: i32, %arg2: memref<2x512xf32, #tpu.memory_space<vmem>>, %arg3: memref<1x512xf32, #tpu.memory_space<vmem>>, %arg4: memref<2x512xf32, #tpu.memory_space<vmem>>) attributes {dimension_semantics = [#tpu.dimension_semantics<parallel>, #tpu.dimension_semantics<parallel>], iteration_bounds = array<i64: 1, 1>, scalar_prefetch = 0 : i64, scratch_operands = 0 : i64, tpu.core_type = #tpu.core_type<tc>, window_params = [{transform_indices = @transform_0, window_bounds = array<i64: 2, 512>}, {transform_indices = @transform_1, window_bounds = array<i64: 1, 512>}, {transform_indices = @transform_2, window_bounds = array<i64: 2, 512>}]} {
    %c0 = arith.constant 0 : index
    %c0_0 = arith.constant 0 : index
    %0 = vector.load %arg2[%c0, %c0_0] : memref<2x512xf32, #tpu.memory_space<vmem>>, vector<2x512xf32>
    %c0_1 = arith.constant 0 : index
    %c0_2 = arith.constant 0 : index
    %1 = vector.load %arg3[%c0_1, %c0_2] : memref<1x512xf32, #tpu.memory_space<vmem>>, vector<1x512xf32>
    %2 = vector.broadcast %1 : vector<1x512xf32> to vector<2x512xf32>
    %3 = arith.addf %0, %2 : vector<2x512xf32>
    %c0_3 = arith.constant 0 : index
    %c0_4 = arith.constant 0 : index
    %4 = vector.load %arg4[%c0_3, %c0_4] : memref<2x512xf32, #tpu.memory_space<vmem>>, vector<2x512xf32>
    tpu.vector_store %arg4[%c0_3, %c0_4], %3 {strides = array<i32>} : memref<2x512xf32, #tpu.memory_space<vmem>>, vector<2x512xf32>,
    return
  }
  func.func @transform_0(%arg0: i32, %arg1: i32) -> (i32, i32) {
    %c0_i32 = arith.constant 0 : i32
    return %arg0, %arg1 : i32, i32
  }
  func.func @transform_1(%arg0: i32, %arg1: i32) -> (i32, i32) {
    %c0_i32 = arith.constant 0 : i32
    %c0_i32_0 = arith.constant 0 : i32
    return %c0_i32, %arg1 : i32, i32
  }
  func.func @transform_2(%arg0: i32, %arg1: i32) -> (i32, i32) {
    %c0_i32 = arith.constant 0 : i32
    return %arg0, %arg1 : i32, i32
  }
}

</mosaic_0001>

<bundles_post_ra>
// kernel: tpu_custom_call.1
= control target key start
LH: loop header
LB: loop body
LE: loop exit
PB: predicated region body
PF: predicated region fallthrough
CT: control target
= control target key end

     0   :  { %7 = vsyncpa [#allocation3], 0  ;;  %s185_s0 = inlined_call_operand.hbm [shape: f32[2,512], index: 0, kind: input, shape index: {}]   ;;  %s186_s1 = inlined_call_operand.hbm [shape: f32[1,512], index: 1, kind: input, shape index: {}]   ;;  %s187_s2 = inlined_call_operand.hbm [shape: f32[2,512], index: 2, kind: output, shape index: {}]  }
   0x1   :  { %8 = vsyncpa [#allocation6], 0 }
   0x2   :  { %9 = vsyncpa [#allocation4], 0  ;;  %s15_s11 = sshll.u32 %s185_s0, 4  ;;  %s158_s12 = smov [#allocation2]   ;;  %s16_s11 = int_to_ptr.hbm [resolvable:$true] %s15_s11 }
   0x3   :  { %s17_s13 = sshll.u32 %s158_s12, 4  ;;  %s26_s16 = sshll.u32 %s186_s1, 4  ;;  %s18_s13 = int_to_ptr.vmem [resolvable:$true] %s17_s13  ;;  %s27_s16 = int_to_ptr.hbm [resolvable:$true] %s26_s16 }
   0x4   :  { %20 = dma.hbm_to_vmem [thread:$0]  %s16_s11, 128, %s18_s13, [#allocation3]  }
   0x5   :  { %s159_s17 = smov [#allocation5]  }
   0x6   :  { %s28_s18 = sshll.u32 %s159_s17, 4  ;;  %s29_s18 = int_to_ptr.vmem [resolvable:$true] %s28_s18 }
   0x7   :  { %31 = dma.hbm_to_vmem [thread:$0]  %s27_s16, 64, %s29_s18, [#allocation6]  }
   0x8   :  { %152 = dma.done.wait [#allocation3], 128  }
   0x9   :  { %153 = vsyncadd [#allocation3], 4294967168 }
   0xa   :  { %154 = dma.done.wait [#allocation6], 64  }
   0xb   :  { %155 = vsyncadd [#allocation6], 4294967232  ;;  %v41_v0 = vld [vmem:[#allocation5] sm:$0xf]  ;;  %vm50_vm0 = vcmask 1041408   ;;  %vm52_vm1 = vcmask 1045508  }
   0xc   :  { %v43_v1 = vperm.slane %v41_v0, 0  ;;  %v44_v2 = vperm.slane %v41_v0, 1  ;;  %v45_v3 = vperm.slane %v41_v0, 2  ;;  %v46_v4 = vperm.slane %v41_v0, 3  ;;  %v40_v8 = vld [vmem:[#allocation2] sm:$0xff]  ;;  %s160_s0 = smov [#allocation7]  }
   0xd   :  { %vm54_vm2 = vcmask 1043456   ;;  %s64_s1 = sshll.u32 %s160_s0, 4  ;;  %s66_s21 = sshll.u32 %s187_s2, 4  ;;  %s65_s1 = int_to_ptr.vmem [resolvable:$true] %s64_s1  ;;  %s67_s21 = int_to_ptr.hbm [resolvable:$true] %s66_s21 }
   0xe   :  { %v47_v5 = vrot.slane %v44_v2, 6  ;;  %v48_v6 = vrot.slane %v45_v3, 4  ;;  %v49_v7 = vrot.slane %v46_v4, 2 }
  0x10   :  { %v51_v9 = vsel %vm50_vm0, %v43_v1, %v47_v5  ;;  %v53_v10 = vsel %vm52_vm1, %v48_v6, %v49_v7 }
  0x11   :  { %v55_v11 = vsel %vm54_vm2, %v51_v9, %v53_v10 }
  0x12   :  { %v57_v12 = vadd.f32 %v55_v11, %v40_v8 }
  0x14   :  { %58 = vst [vmem:[#allocation7] sm:$0xff] %v57_v12 }
  0x15   :  { %69 = dma.vmem_to_hbm [thread:$0]  %s65_s1, 128, %s67_s21, [#allocation4]  }
  0x16   :  { %156 = dma.done.wait [#allocation4], 128  }
  0x17   :  { %157 = vsyncadd [#allocation4], 4294967168 }
  0x18   :  { %74 = vsyncpa [#allocation3], 1 }
  0x19   :  { %75 = vsyncpa [#allocation6], 1 }
  0x1a   :  { %76 = vsyncpa [#allocation4], 1 }

</bundles_post_ra>
